<compile_context>
chip_gen: v7x
topology: tpu7x:2x2x1
jax: 0.10.0
libtpu: 0.0.40
codegen_flags: <defaults>
</compile_context>

<pallas_src>
import functools
import math

import jax
import jax.numpy as jnp
from jax.experimental import pallas as pl
from jax.experimental.pallas import tpu as pltpu


# ----------------------------------------------------------------------------------
# In-kernel math helpers
# ----------------------------------------------------------------------------------

def _erf_poly(x):
    # Abramowitz & Stegun 7.1.26 rational approximation (|err| < 1.5e-7).  Used
    # instead of lax.erf (not guaranteed to lower in Mosaic); matches PyTorch's
    # exact (erf-based) nn.GELU to ~1e-7.  Operates on a single (TB, E) tile once
    # per batch block, so the divide is negligible.
    p = 0.3275911
    a1, a2, a3, a4, a5 = 0.254829592, -0.284496736, 1.421413741, -1.453152027, 1.061405429
    sgn = jnp.where(x >= 0.0, 1.0, -1.0)
    ax = jnp.abs(x)
    t = 1.0 / (1.0 + p * ax)
    poly = ((((a5 * t + a4) * t + a3) * t + a2) * t + a1) * t
    return sgn * (1.0 - poly * jnp.exp(-ax * ax))


def _gelu_exact(x):
    return 0.5 * x * (1.0 + _erf_poly(x * (1.0 / math.sqrt(2.0))))


# ----------------------------------------------------------------------------------
# Kernel
# ----------------------------------------------------------------------------------

def _make_fused_head_kernel(pol_pad, inv_s_total):
    """pol_pad: 128-aligned width of the policy block; value/nsv sit at cols
    pol_pad / pol_pad+1 (i.e. in the final 128-lane block of the output)."""

    def kernel(gnn_ref, cnn_ref, wpg_ref, wpc_ref, bproj_ref, gamma_ref, beta_ref,
               whead_ref, bhead_ref, out_ref, cnn_acc_ref):
        s = pl.program_id(1)

        @pl.when(s == 0)
        def _():
            cnn_acc_ref[...] = jnp.zeros_like(cnn_acc_ref)

        # Streamed CNN pooling in the native (TB, E, TS) layout: reduce the spatial
        # (lane) axis of this tile and accumulate in f32.  Cast-on-read keeps the HBM
        # stream in the producer's dtype (bf16 halves DMA bytes on the mem-bound path).
        cnn_acc_ref[...] += jnp.sum(cnn_ref[...].astype(jnp.float32), axis=-1)

        @pl.when(s == pl.num_programs(1) - 1)
        def _():
            # gnn_out.view(B, 64, E).mean(dim=1): sublane reduce -> (TB, E)
            gnn_pooled = jnp.mean(gnn_ref[...].astype(jnp.float32), axis=1)
            # cnn_out.view(B, E, -1).mean(dim=2): finalize streamed sum -> (TB, E)
            cnn_pooled = cnn_acc_ref[...] * inv_s_total

            # embedding_projection: Linear(2E->E) split into two E-wide dots summed
            # (identical math to cat + single dot, avoids a cross-lane relayout when
            # E is not a multiple of 128), then exact GELU, then LayerNorm(E).
            h = (jnp.dot(gnn_pooled, wpg_ref[...], preferred_element_type=jnp.float32)
                 + jnp.dot(cnn_pooled, wpc_ref[...], preferred_element_type=jnp.float32)
                 + bproj_ref[...])
            h = _gelu_exact(h)
            mu = jnp.mean(h, axis=-1, keepdims=True)
            c = h - mu
            var = jnp.mean(c * c, axis=-1, keepdims=True)          # biased var, eps=1e-5
            hn = c * jax.lax.rsqrt(var + 1e-5) * gamma_ref[...] + beta_ref[...]

            # policy / value / next-state-value heads fused into ONE lane-dense matmul.
            #   cols [0, P)            -> policy logits
            #   cols [P, pol_pad)      -> zero padding
            #   col  pol_pad           -> value        (tanh)
            #   col  pol_pad + 1       -> next-state   (tanh)
            # tanh is applied only to the final 128-lane block; both stores are
            # lane-aligned and unmasked.
            y = (jnp.dot(hn, whead_ref[...], preferred_element_type=jnp.float32)
                 + bhead_ref[...])
            out_ref[:, :pol_pad] = y[:, :pol_pad]
            out_ref[:, pol_pad:] = jnp.tanh(y[:, pol_pad:])

    return kernel


# ----------------------------------------------------------------------------------
# Tiling / VMEM planning
# ----------------------------------------------------------------------------------

def _vmem_budget_bytes():
    cap = 64 * 1024 * 1024  # conservative (v7x physical VMEM per TC)
    try:
        info = pltpu.get_tpu_info()
        cap = int(getattr(info, "vmem_capacity_bytes", cap))
    except Exception:
        pass
    return min(cap * 3 // 4, 96 * 1024 * 1024)


def _batch_tiling(B, target):
    """Return (TB, B_pad).  TB is 8-aligned (or == B), keeps >=2 blocks when B >= 16
    so the 'parallel' grid axis shards across both v7x TensorCores."""
    if B >= 16:
        target = min(target, max(8, (B // 2) // 8 * 8))
    target = max(8, target)
    if B <= target:
        return B, B
    for t in range(target, 7, -1):
        if t % 8 == 0 and B % t == 0:
            return t, B
    # No aligned divisor: pad the batch; prefer the largest tile with small waste.
    best_t, best_pad = 8, -(-B // 8) * 8
    for t in range(16, target + 1, 8):
        pad = -(-B // t) * t
        if pad - B <= max(8, pad // 8):
            best_t, best_pad = t, pad
    return best_t, best_pad


def _spatial_tiling(S, max_ts):
    """Return (TS, S_pad).  TS is a multiple of 128 (or == S)."""
    if S <= max_ts:
        return S, S
    top = max(128, (max_ts // 128) * 128)
    for t in range(top, 127, -128):
        if S % t == 0:
            return t, S
    S_pad = -(-S // top) * top
    return top, S_pad


def _plan_tiles(B, S, E, ppad_total, in_bytes):
    budget = _vmem_budget_bytes()
    tb_target = 128
    while True:
        TB, B_pad = _batch_tiling(B, tb_target)
        fixed = 2 * (2 * E * E + 3 * E + E * ppad_total + ppad_total) * 4  # weights
        fixed += 2 * TB * ppad_total * 4                                   # out block
        fixed += TB * E * 4                                                # scratch
        fixed += 2 * TB * 64 * E * in_bytes                                # gnn block
        avail = budget - fixed - (4 << 20)                                 # headroom
        per_ts = 2 * TB * E * in_bytes                                     # cnn, 2-buf
        if avail >= per_ts * 128 or tb_target <= 8:
            break
        tb_target //= 2
    max_ts = max(128, min(avail // per_ts, (8 << 20) // max(1, TB * E * in_bytes)))
    TS, S_pad = _spatial_tiling(S, int(max_ts))
    return TB, B_pad, TS, S_pad, budget


# ----------------------------------------------------------------------------------
# Params
# ----------------------------------------------------------------------------------

def init_params(key, embed_dim, policy_size):
    """Deterministic, PyTorch-Linear-style uniform init (shapes from __init__)."""
    E, P = embed_dim, policy_size
    ks = jax.random.split(key, 8)

    def uni(k, shape, fan_in):
        bound = 1.0 / math.sqrt(fan_in)
        return jax.random.uniform(k, shape, jnp.float32, -bound, bound)

    return {
        "w_proj": uni(ks[0], (2 * E, E), 2 * E),     # Linear(2E -> E), (in, out) layout
        "b_proj": uni(ks[1], (1, E), 2 * E),
        "ln_gamma": jnp.ones((1, E), jnp.float32),   # nn.LayerNorm default affine
        "ln_beta": jnp.zeros((1, E), jnp.float32),
        "w_policy": uni(ks[2], (E, P), E),           # Linear(E -> policy_size)
        "b_policy": uni(ks[3], (1, P), E),
        "w_value": uni(ks[4], (E, 1), E),            # Linear(E -> 1)
        "b_value": uni(ks[5], (1, 1), E),
        "w_nsv": uni(ks[6], (E, 1), E),              # Linear(E -> 1)
        "b_nsv": uni(ks[7], (1, 1), E),
    }


def prepare_params(params):
    """Pack heads / split projection ONCE per params (hoisted out of the forward)."""
    E = params["w_proj"].shape[1]
    P = params["w_policy"].shape[1]
    pol_pad = -(-P // 128) * 128
    ppad_total = pol_pad + 128
    f32 = jnp.float32

    w_head = jnp.zeros((E, ppad_total), f32)
    w_head = w_head.at[:, :P].set(params["w_policy"].astype(f32))
    w_head = w_head.at[:, pol_pad].set(params["w_value"][:, 0].astype(f32))
    w_head = w_head.at[:, pol_pad + 1].set(params["w_nsv"][:, 0].astype(f32))
    b_head = jnp.zeros((1, ppad_total), f32)
    b_head = b_head.at[:, :P].set(params["b_policy"].astype(f32))
    b_head = b_head.at[:, pol_pad].set(params["b_value"][:, 0].astype(f32))
    b_head = b_head.at[:, pol_pad + 1].set(params["b_nsv"][:, 0].astype(f32))

    return {
        "w_proj_g": params["w_proj"][:E].astype(f32),   # gnn half of Linear(2E->E)
        "w_proj_c": params["w_proj"][E:].astype(f32),   # cnn half
        "b_proj": params["b_proj"].astype(f32),
        "ln_gamma": params["ln_gamma"].astype(f32),
        "ln_beta": params["ln_beta"].astype(f32),
        "w_head": w_head,
        "b_head": b_head,
    }


# ----------------------------------------------------------------------------------
# Forward
# ----------------------------------------------------------------------------------

@functools.partial(jax.jit, static_argnames=("policy_size",))
def value_next_state_forward(gnn_out, cnn_out, packed, *, policy_size):
    """gnn_out: (B*64, E) node embeddings (native dtype).
       cnn_out: (B, E, H', W') feature map (native dtype)."""
    B, E = cnn_out.shape[0], cnn_out.shape[1]
    S = cnn_out.shape[2] * cnn_out.shape[3]
    ppad_total = packed["w_head"].shape[1]
    pol_pad = ppad_total - 128
    in_bytes = max(jnp.dtype(gnn_out.dtype).itemsize, jnp.dtype(cnn_out.dtype).itemsize)

    gnn_r = gnn_out.reshape(B, 64, E)     # gnn_out.view(B, 64, E)       (no copy)
    cnn_r = cnn_out.reshape(B, E, S)      # cnn_out.view(B, E, -1), native layout

    TB, B_pad, TS, S_pad, budget = _plan_tiles(B, S, E, ppad_total, in_bytes)
    if B_pad > B:
        gnn_r = jnp.pad(gnn_r, ((0, B_pad - B), (0, 0), (0, 0)))
        cnn_r = jnp.pad(cnn_r, ((0, B_pad - B), (0, 0), (0, 0)))
    if S_pad > S:
        # Zero-padding along S is harmless: the kernel sums and divides by the true S.
        cnn_r = jnp.pad(cnn_r, ((0, 0), (0, 0), (0, S_pad - S)))

    weights = (packed["w_proj_g"], packed["w_proj_c"], packed["b_proj"],
               packed["ln_gamma"], packed["ln_beta"], packed["w_head"],
               packed["b_head"])

    def invariant(w):
        return pl.BlockSpec(w.shape, lambda b, s, _n=w.ndim: (0,) * _n)

    grid = (B_pad // TB, S_pad // TS)
    combined = pl.pallas_call(
        _make_fused_head_kernel(pol_pad, 1.0 / float(S)),
        grid=grid,
        in_specs=[pl.BlockSpec((TB, 64, E), lambda b, s: (b, 0, 0)),
                  pl.BlockSpec((TB, E, TS), lambda b, s: (b, 0, s))]
                 + [invariant(w) for w in weights],
        out_specs=pl.BlockSpec((TB, ppad_total), lambda b, s: (b, 0)),
        out_shape=jax.ShapeDtypeStruct((B_pad, ppad_total), jnp.float32),
        scratch_shapes=[pltpu.VMEM((TB, E), jnp.float32)],
        compiler_params=pltpu.CompilerParams(
            dimension_semantics=("parallel", "arbitrary"),
            vmem_limit_bytes=int(budget)),
    )(gnn_r, cnn_r, *weights)

    P = policy_size
    policy_logits = combined[:B, :P]
    value = combined[:B, pol_pad:pol_pad + 1]
    next_state_value = combined[:B, pol_pad + 1:pol_pad + 2]
    return policy_logits, value, next_state_value


# ----------------------------------------------------------------------------------
# Pure-JAX reference (mirrors the PyTorch forward, exact erf GELU)
# ----------------------------------------------------------------------------------

def _reference_forward(gnn_out, cnn_out, params):
    B = cnn_out.shape[0]
    E = params["w_proj"].shape[1]
    gnn_pooled = gnn_out.astype(jnp.float32).reshape(B, 64, E).mean(axis=1)
    cnn_pooled = cnn_out.astype(jnp.float32).reshape(B, E, -1).mean(axis=2)
    fused = jnp.concatenate([gnn_pooled, cnn_pooled], axis=-1)
    h = fused @ params["w_proj"] + params["b_proj"]
    h = jax.nn.gelu(h, approximate=False)
    mu = h.mean(-1, keepdims=True)
    var = ((h - mu) ** 2).mean(-1, keepdims=True)
    hn = (h - mu) / jnp.sqrt(var + 1e-5) * params["ln_gamma"] + params["ln_beta"]
    pol = hn @ params["w_policy"] + params["b_policy"]
    val = jnp.tanh(hn @ params["w_value"] + params["b_value"])
    nsv = jnp.tanh(hn @ params["w_nsv"] + params["b_nsv"])
    return pol, val, nsv


if __name__ == "__main__":
    B, E, P = 2, 32, 128          # batch, embed_dim, policy_size
    Hc = Wc = 8                   # CNN feature-map spatial size -> S = 64

    key = jax.random.PRNGKey(0)
    k_gnn, k_cnn, k_param = jax.random.split(key, 3)

    # TODO(synk): UnifiedGNN / CNNModel definitions are not provided in the source;
    # their outputs (gnn_out: (B*64, E) node embeddings, cnn_out: (B, E, H', W')
    # feature map) are synthesized here and fed into the fusion/head kernel.
    gnn_out = jax.random.normal(k_gnn, (B * 64, E), jnp.float32)
    cnn_out = jax.random.normal(k_cnn, (B, E, Hc, Wc), jnp.float32)

    params = init_params(k_param, E, P)
    packed = prepare_params(params)     # hoisted: packed once per params, not per call

    policy_logits, value, next_state_value = value_next_state_forward(
        gnn_out, cnn_out, packed, policy_size=P)
    jax.block_until_ready((policy_logits, value, next_state_value))

    assert policy_logits.shape == (B, P)
    assert value.shape == (B, 1)
    assert next_state_value.shape == (B, 1)
    assert bool(jnp.all(jnp.abs(value) <= 1.0)) and bool(jnp.all(jnp.abs(next_state_value) <= 1.0))

    # Numerical check against a pure-JAX reference (tol covers the erf polynomial
    # in-kernel GELU + EUP transcendental precision).
    ref_pol, ref_val, ref_nsv = _reference_forward(gnn_out, cnn_out, params)
    assert float(jnp.max(jnp.abs(policy_logits - ref_pol))) < 2e-3
    assert float(jnp.max(jnp.abs(value - ref_val))) < 2e-3
    assert float(jnp.max(jnp.abs(next_state_value - ref_nsv))) < 2e-3

    print("KERNEL_OK")
</pallas_src>

<mosaic_0001>
module attributes {stable_mosaic.version = 11 : i64} {
  func.func @kernel(%arg0: i32, %arg1: i32, %arg2: memref<2x64x32xf32, #tpu.memory_space<vmem>>, %arg3: memref<2x32x64xf32, #tpu.memory_space<vmem>>, %arg4: memref<32x32xf32, #tpu.memory_space<vmem>>, %arg5: memref<32x32xf32, #tpu.memory_space<vmem>>, %arg6: memref<1x32xf32, #tpu.memory_space<vmem>>, %arg7: memref<1x32xf32, #tpu.memory_space<vmem>>, %arg8: memref<1x32xf32, #tpu.memory_space<vmem>>, %arg9: memref<32x256xf32, #tpu.memory_space<vmem>>, %arg10: memref<1x256xf32, #tpu.memory_space<vmem>>, %arg11: memref<2x256xf32, #tpu.memory_space<vmem>>, %arg12: memref<2x32xf32, #tpu.memory_space<vmem>>) attributes {dimension_semantics = [#tpu.dimension_semantics<parallel>, #tpu.dimension_semantics<arbitrary>], iteration_bounds = array<i64: 1, 1>, scalar_prefetch = 0 : i64, scratch_operands = 1 : i64, tpu.core_type = #tpu.core_type<tc>, window_params = [{transform_indices = @transform_0, window_bounds = array<i64: 2, 64, 32>}, {transform_indices = @transform_1, window_bounds = array<i64: 2, 32, 64>}, {pipeline_mode = #tpu.pipeline_mode<synchronous>, transform_indices = @transform_2, window_bounds = array<i64: 32, 32>}, {pipeline_mode = #tpu.pipeline_mode<synchronous>, transform_indices = @transform_3, window_bounds = array<i64: 32, 32>}, {pipeline_mode = #tpu.pipeline_mode<synchronous>, transform_indices = @transform_4, window_bounds = array<i64: 1, 32>}, {pipeline_mode = #tpu.pipeline_mode<synchronous>, transform_indices = @transform_5, window_bounds = array<i64: 1, 32>}, {pipeline_mode = #tpu.pipeline_mode<synchronous>, transform_indices = @transform_6, window_bounds = array<i64: 1, 32>}, {pipeline_mode = #tpu.pipeline_mode<synchronous>, transform_indices = @transform_7, window_bounds = array<i64: 32, 256>}, {pipeline_mode = #tpu.pipeline_mode<synchronous>, transform_indices = @transform_8, window_bounds = array<i64: 1, 256>}, {transform_indices = @transform_9, window_bounds = array<i64: 2, 256>}]} {
    %c0_i32 = arith.constant 0 : i32
    %0 = arith.cmpi eq, %arg1, %c0_i32 : i32
    %1 = arith.extui %0 : i1 to i32
    %c0_i32_0 = arith.constant 0 : i32
    %2 = arith.cmpi ne, %1, %c0_i32_0 : i32
    scf.if %2 {
      %cst_9 = arith.constant 0.000000e+00 : f32
      %11 = vector.broadcast %cst_9 : f32 to vector<2x32xf32>
      %c0_10 = arith.constant 0 : index
      %c0_11 = arith.constant 0 : index
      %12 = vector.load %arg12[%c0_10, %c0_11] : memref<2x32xf32, #tpu.memory_space<vmem>>, vector<2x32xf32>
      tpu.vector_store %arg12[%c0_10, %c0_11], %11 {strides = array<i32>} : memref<2x32xf32, #tpu.memory_space<vmem>>, vector<2x32xf32>,
    } else {
    }
    %c0 = arith.constant 0 : index
    %c0_1 = arith.constant 0 : index
    %3 = vector.load %arg12[%c0, %c0_1] : memref<2x32xf32, #tpu.memory_space<vmem>>, vector<2x32xf32>
    %c0_2 = arith.constant 0 : index
    %c0_3 = arith.constant 0 : index
    %c0_4 = arith.constant 0 : index
    %4 = vector.load %arg3[%c0_2, %c0_3, %c0_4] : memref<2x32x64xf32, #tpu.memory_space<vmem>>, vector<2x32x64xf32>
    %cst = arith.constant dense<0.000000e+00> : vector<2x32xf32>
    %5 = vector.multi_reduction <add>, %4, %cst [2] : vector<2x32x64xf32> to vector<2x32xf32>
    %6 = arith.addf %3, %5 : vector<2x32xf32>
    %c0_5 = arith.constant 0 : index
    %c0_6 = arith.constant 0 : index
    %7 = vector.load %arg12[%c0_5, %c0_6] : memref<2x32xf32, #tpu.memory_space<vmem>>, vector<2x32xf32>
    tpu.vector_store %arg12[%c0_5, %c0_6], %6 {strides = array<i32>} : memref<2x32xf32, #tpu.memory_space<vmem>>, vector<2x32xf32>,
    %c0_i32_7 = arith.constant 0 : i32
    %8 = arith.cmpi eq, %arg1, %c0_i32_7 : i32
    %9 = arith.extui %8 : i1 to i32
    %c0_i32_8 = arith.constant 0 : i32
    %10 = arith.cmpi ne, %9, %c0_i32_8 : i32
    scf.if %10 {
      %c0_9 = arith.constant 0 : index
      %c0_10 = arith.constant 0 : index
      %c0_11 = arith.constant 0 : index
      %11 = vector.load %arg2[%c0_9, %c0_10, %c0_11] : memref<2x64x32xf32, #tpu.memory_space<vmem>>, vector<2x64x32xf32>
      %cst_12 = arith.constant dense<0.000000e+00> : vector<2x32xf32>
      %12 = vector.multi_reduction <add>, %11, %cst_12 [1] : vector<2x64x32xf32> to vector<2x32xf32>
      %cst_13 = arith.constant 6.400000e+01 : f32
      %13 = vector.broadcast %cst_13 : f32 to vector<2x32xf32>
      %14 = arith.divf %12, %13 : vector<2x32xf32>
      %c0_14 = arith.constant 0 : index
      %c0_15 = arith.constant 0 : index
      %15 = vector.load %arg12[%c0_14, %c0_15] : memref<2x32xf32, #tpu.memory_space<vmem>>, vector<2x32xf32>
      %cst_16 = arith.constant 1.562500e-02 : f32
      %16 = vector.broadcast %cst_16 : f32 to vector<2x32xf32>
      %17 = arith.mulf %15, %16 : vector<2x32xf32>
      %c0_17 = arith.constant 0 : index
      %c0_18 = arith.constant 0 : index
      %18 = vector.load %arg4[%c0_17, %c0_18] : memref<32x32xf32, #tpu.memory_space<vmem>>, vector<32x32xf32>
      %cst_19 = arith.constant dense<0.000000e+00> : vector<2x32xf32>
      %19 = tpu.matmul %14, %18, %cst_19 {dimension_numbers = #tpu.dot_dimension_numbers<[1], [0], [0], [1], [0, 0, 1, 1], [], []>} : vector<2x32xf32>, vector<32x32xf32>, vector<2x32xf32> -> vector<2x32xf32>
      %c0_20 = arith.constant 0 : index
      %c0_21 = arith.constant 0 : index
      %20 = vector.load %arg5[%c0_20, %c0_21] : memref<32x32xf32, #tpu.memory_space<vmem>>, vector<32x32xf32>
      %cst_22 = arith.constant dense<0.000000e+00> : vector<2x32xf32>
      %21 = tpu.matmul %17, %20, %cst_22 {dimension_numbers = #tpu.dot_dimension_numbers<[1], [0], [0], [1], [0, 0, 1, 1], [], []>} : vector<2x32xf32>, vector<32x32xf32>, vector<2x32xf32> -> vector<2x32xf32>
      %22 = arith.addf %19, %21 : vector<2x32xf32>
      %c0_23 = arith.constant 0 : index
      %c0_24 = arith.constant 0 : index
      %23 = vector.load %arg6[%c0_23, %c0_24] : memref<1x32xf32, #tpu.memory_space<vmem>>, vector<1x32xf32>
      %24 = vector.broadcast %23 : vector<1x32xf32> to vector<2x32xf32>
      %25 = arith.addf %22, %24 : vector<2x32xf32>
      %cst_25 = arith.constant 5.000000e-01 : f32
      %26 = vector.broadcast %cst_25 : f32 to vector<2x32xf32>
      %27 = arith.mulf %26, %25 : vector<2x32xf32>
      %cst_26 = arith.constant 0.707106769 : f32
      %28 = vector.broadcast %cst_26 : f32 to vector<2x32xf32>
      %29 = arith.mulf %25, %28 : vector<2x32xf32>
      %cst_27 = arith.constant 0.000000e+00 : f32
      %30 = vector.broadcast %cst_27 : f32 to vector<2x32xf32>
      %31 = arith.cmpf oge, %29, %30 : vector<2x32xf32>
      %cst_28 = arith.constant 1.000000e+00 : f32
      %cst_29 = arith.constant -1.000000e+00 : f32
      %32 = vector.broadcast %cst_28 : f32 to vector<2x32xf32>
      %33 = vector.broadcast %cst_29 : f32 to vector<2x32xf32>
      %34 = arith.select %31, %32, %33 : vector<2x32xi1>, vector<2x32xf32>
      %35 = math.absf %29 : vector<2x32xf32>
      %cst_30 = arith.constant 0.327591091 : f32
      %36 = vector.broadcast %cst_30 : f32 to vector<2x32xf32>
      %37 = arith.mulf %36, %35 : vector<2x32xf32>
      %cst_31 = arith.constant 1.000000e+00 : f32
      %38 = vector.broadcast %cst_31 : f32 to vector<2x32xf32>
      %39 = arith.addf %38, %37 : vector<2x32xf32>
      %cst_32 = arith.constant 1.000000e+00 : f32
      %40 = vector.broadcast %cst_32 : f32 to vector<2x32xf32>
      %41 = arith.divf %40, %39 : vector<2x32xf32>
      %cst_33 = arith.constant 1.06140542 : f32
      %42 = vector.broadcast %cst_33 : f32 to vector<2x32xf32>
      %43 = arith.mulf %42, %41 : vector<2x32xf32>
      %cst_34 = arith.constant -1.45315206 : f32
      %44 = vector.broadcast %cst_34 : f32 to vector<2x32xf32>
      %45 = arith.addf %43, %44 : vector<2x32xf32>
      %46 = arith.mulf %45, %41 : vector<2x32xf32>
      %cst_35 = arith.constant 1.42141378 : f32
      %47 = vector.broadcast %cst_35 : f32 to vector<2x32xf32>
      %48 = arith.addf %46, %47 : vector<2x32xf32>
      %49 = arith.mulf %48, %41 : vector<2x32xf32>
      %cst_36 = arith.constant -0.284496725 : f32
      %50 = vector.broadcast %cst_36 : f32 to vector<2x32xf32>
      %51 = arith.addf %49, %50 : vector<2x32xf32>
      %52 = arith.mulf %51, %41 : vector<2x32xf32>
      %cst_37 = arith.constant 0.254829586 : f32
      %53 = vector.broadcast %cst_37 : f32 to vector<2x32xf32>
      %54 = arith.addf %52, %53 : vector<2x32xf32>
      %55 = arith.mulf %54, %41 : vector<2x32xf32>
      %cst_38 = arith.constant 0.000000e+00 : f32
      %56 = vector.broadcast %cst_38 : f32 to vector<2x32xf32>
      %57 = arith.subf %56, %35 : vector<2x32xf32>
      %58 = arith.mulf %57, %35 : vector<2x32xf32>
      %59 = math.exp %58 : vector<2x32xf32>
      %60 = arith.mulf %55, %59 : vector<2x32xf32>
      %cst_39 = arith.constant 1.000000e+00 : f32
      %61 = vector.broadcast %cst_39 : f32 to vector<2x32xf32>
      %62 = arith.subf %61, %60 : vector<2x32xf32>
      %63 = arith.mulf %34, %62 : vector<2x32xf32>
      %cst_40 = arith.constant 1.000000e+00 : f32
      %64 = vector.broadcast %cst_40 : f32 to vector<2x32xf32>
      %65 = arith.addf %64, %63 : vector<2x32xf32>
      %66 = arith.mulf %27, %65 : vector<2x32xf32>
      %cst_41 = arith.constant dense<0.000000e+00> : vector<2xf32>
      %67 = vector.multi_reduction <add>, %66, %cst_41 [1] : vector<2x32xf32> to vector<2xf32>
      %68 = vector.shape_cast %67 : vector<2xf32> to vector<2x1xf32>
      %cst_42 = arith.constant 3.200000e+01 : f32
      %69 = vector.broadcast %cst_42 : f32 to vector<2x1xf32>
      %70 = arith.divf %68, %69 : vector<2x1xf32>
      %71 = vector.broadcast %70 : vector<2x1xf32> to vector<2x32xf32>
      %72 = arith.subf %66, %71 : vector<2x32xf32>
      %73 = arith.mulf %72, %72 : vector<2x32xf32>
      %cst_43 = arith.constant dense<0.000000e+00> : vector<2xf32>
      %74 = vector.multi_reduction <add>, %73, %cst_43 [1] : vector<2x32xf32> to vector<2xf32>
      %75 = vector.shape_cast %74 : vector<2xf32> to vector<2x1xf32>
      %cst_44 = arith.constant 3.200000e+01 : f32
      %76 = vector.broadcast %cst_44 : f32 to vector<2x1xf32>
      %77 = arith.divf %75, %76 : vector<2x1xf32>
      %cst_45 = arith.constant 9.99999974E-6 : f32
      %78 = vector.broadcast %cst_45 : f32 to vector<2x1xf32>
      %79 = arith.addf %77, %78 : vector<2x1xf32>
      %80 = math.rsqrt %79 : vector<2x1xf32>
      %81 = vector.broadcast %80 : vector<2x1xf32> to vector<2x32xf32>
      %82 = arith.mulf %72, %81 : vector<2x32xf32>
      %c0_46 = arith.constant 0 : index
      %c0_47 = arith.constant 0 : index
      %83 = vector.load %arg7[%c0_46, %c0_47] : memref<1x32xf32, #tpu.memory_space<vmem>>, vector<1x32xf32>
      %84 = vector.broadcast %83 : vector<1x32xf32> to vector<2x32xf32>
      %85 = arith.mulf %82, %84 : vector<2x32xf32>
      %c0_48 = arith.constant 0 : index
      %c0_49 = arith.constant 0 : index
      %86 = vector.load %arg8[%c0_48, %c0_49] : memref<1x32xf32, #tpu.memory_space<vmem>>, vector<1x32xf32>
      %87 = vector.broadcast %86 : vector<1x32xf32> to vector<2x32xf32>
      %88 = arith.addf %85, %87 : vector<2x32xf32>
      %c0_50 = arith.constant 0 : index
      %c0_51 = arith.constant 0 : index
      %89 = vector.load %arg9[%c0_50, %c0_51] : memref<32x256xf32, #tpu.memory_space<vmem>>, vector<32x256xf32>
      %cst_52 = arith.constant dense<0.000000e+00> : vector<2x256xf32>
      %90 = tpu.matmul %88, %89, %cst_52 {dimension_numbers = #tpu.dot_dimension_numbers<[1], [0], [0], [1], [0, 0, 1, 1], [], []>} : vector<2x32xf32>, vector<32x256xf32>, vector<2x256xf32> -> vector<2x256xf32>
      %c0_53 = arith.constant 0 : index
      %c0_54 = arith.constant 0 : index
      %91 = vector.load %arg10[%c0_53, %c0_54] : memref<1x256xf32, #tpu.memory_space<vmem>>, vector<1x256xf32>
      %92 = vector.broadcast %91 : vector<1x256xf32> to vector<2x256xf32>
      %93 = arith.addf %90, %92 : vector<2x256xf32>
      %94 = vector.extract_strided_slice %93 {offsets = [0, 0], sizes = [2, 128], strides = [1, 1]} : vector<2x256xf32> to vector<2x128xf32>
      %c0_55 = arith.constant 0 : index
      %c0_56 = arith.constant 0 : index
      %95 = vector.load %arg11[%c0_55, %c0_56] : memref<2x256xf32, #tpu.memory_space<vmem>>, vector<2x128xf32>
      tpu.vector_store %arg11[%c0_55, %c0_56], %94 {strides = array<i32>} : memref<2x256xf32, #tpu.memory_space<vmem>>, vector<2x128xf32>,
      %96 = vector.extract_strided_slice %93 {offsets = [0, 128], sizes = [2, 128], strides = [1, 1]} : vector<2x256xf32> to vector<2x128xf32>
      %97 = math.tanh %96 : vector<2x128xf32>
      %c0_57 = arith.constant 0 : index
      %c128 = arith.constant 128 : index
      %98 = vector.load %arg11[%c0_57, %c128] : memref<2x256xf32, #tpu.memory_space<vmem>>, vector<2x128xf32>
      tpu.vector_store %arg11[%c0_57, %c128], %97 {strides = array<i32>} : memref<2x256xf32, #tpu.memory_space<vmem>>, vector<2x128xf32>,
    } else {
    }
    return
  }
  func.func @transform_0(%arg0: i32, %arg1: i32) -> (i32, i32, i32) {
    %c0_i32 = arith.constant 0 : i32
    %c0_i32_0 = arith.constant 0 : i32
    %c0_i32_1 = arith.constant 0 : i32
    return %arg0, %c0_i32, %c0_i32_0 : i32, i32, i32
  }
  func.func @transform_1(%arg0: i32, %arg1: i32) -> (i32, i32, i32) {
    %c0_i32 = arith.constant 0 : i32
    %c0_i32_0 = arith.constant 0 : i32
    return %arg0, %c0_i32, %arg1 : i32, i32, i32
  }
  func.func @transform_2(%arg0: i32, %arg1: i32) -> (i32, i32) {
    %c0_i32 = arith.constant 0 : i32
    %c0_i32_0 = arith.constant 0 : i32
    %c0_i32_1 = arith.constant 0 : i32
    return %c0_i32, %c0_i32_0 : i32, i32
  }
  func.func @transform_3(%arg0: i32, %arg1: i32) -> (i32, i32) {
    %c0_i32 = arith.constant 0 : i32
    %c0_i32_0 = arith.constant 0 : i32
    %c0_i32_1 = arith.constant 0 : i32
    return %c0_i32, %c0_i32_0 : i32, i32
  }
  func.func @transform_4(%arg0: i32, %arg1: i32) -> (i32, i32) {
    %c0_i32 = arith.constant 0 : i32
    %c0_i32_0 = arith.constant 0 : i32
    %c0_i32_1 = arith.constant 0 : i32
    return %c0_i32, %c0_i32_0 : i32, i32
  }
  func.func @transform_5(%arg0: i32, %arg1: i32) -> (i32, i32) {
    %c0_i32 = arith.constant 0 : i32
    %c0_i32_0 = arith.constant 0 : i32
    %c0_i32_1 = arith.constant 0 : i32
    return %c0_i32, %c0_i32_0 : i32, i32
  }
  func.func @transform_6(%arg0: i32, %arg1: i32) -> (i32, i32) {
    %c0_i32 = arith.constant 0 : i32
    %c0_i32_0 = arith.constant 0 : i32
    %c0_i32_1 = arith.constant 0 : i32
    return %c0_i32, %c0_i32_0 : i32, i32
  }
  func.func @transform_7(%arg0: i32, %arg1: i32) -> (i32, i32) {
    %c0_i32 = arith.constant 0 : i32
    %c0_i32_0 = arith.constant 0 : i32
    %c0_i32_1 = arith.constant 0 : i32
    return %c0_i32, %c0_i32_0 : i32, i32
  }
  func.func @transform_8(%arg0: i32, %arg1: i32) -> (i32, i32) {
    %c0_i32 = arith.constant 0 : i32
    %c0_i32_0 = arith.constant 0 : i32
    %c0_i32_1 = arith.constant 0 : i32
    return %c0_i32, %c0_i32_0 : i32, i32
  }
  func.func @transform_9(%arg0: i32, %arg1: i32) -> (i32, i32) {
    %c0_i32 = arith.constant 0 : i32
    %c0_i32_0 = arith.constant 0 : i32
    return %arg0, %c0_i32 : i32, i32
  }
}

</mosaic_0001>

<bundles_post_ra>
// kernel: value_next_state_forward.1
= control target key start
LH: loop header
LB: loop body
LE: loop exit
PB: predicated region body
PF: predicated region fallthrough
CT: control target
= control target key end

     0   :  { %vm47_vm0 = vcmask 523264   ;;  %vm151_vm1 = vcmask 261120   ;;  %vm36_vm2 = vcmask 254976   ;;  %v591_v53 = vmov 0.0   ;;  %s828_s1 = inlined_call_operand.vmem [shape: f32[2,32,64], index: 1, kind: input, shape index: {}]   ;;  %s829_s0 = inlined_call_operand.vmem [shape: f32[2,64,32], index: 0, kind: input, shape index: {}]   ;;  %s830_s2 = inlined_call_operand.vmem [shape: f32[32,32], index: 2, kind: input, shape index: {}]   ;;  %s831_s3 = inlined_call_operand.vmem [shape: f32[32,32], index: 3, kind: input, shape index: {}]   ;;  %s832_s4 = inlined_call_operand.vmem [shape: f32[1,32], index: 4, kind: input, shape index: {}]   ;;  %s833_s7 = inlined_call_operand.vmem [shape: f32[32,256], index: 7, kind: input, shape index: {}]   ;;  %s834_s5 = inlined_call_operand.vmem [shape: f32[1,32], index: 5, kind: input, shape index: {}]   ;;  %s835_s6 = inlined_call_operand.vmem [shape: f32[1,32], index: 6, kind: input, shape index: {}]   ;;  %s836_s8 = inlined_call_operand.vmem [shape: f32[1,256], index: 8, kind: input, shape index: {}]   ;;  %s837_s9 = inlined_call_operand.vmem [shape: f32[2,256], index: 9, kind: output, shape index: {}]  }
   0x1   :  { %v43_v0 = vld [vmem:[%s828_s1 + $0x20] sm:$0xff]  ;;  %v44_v2 = vld [vmem:[%s828_s1 + $0x28] sm:$0xff]  ;;  %v45_v8 = vld [vmem:[%s828_s1 + $0x30] sm:$0xff]  ;;  %37 = vst.msk [vmem:[#allocation2] sm:$0x3] %vm36_vm2, %v591_v53  ;;  %vm593_vm3 = vmmov 0  }
   0x2   :  { %v39_v1 = vld [vmem:[%s828_s1] sm:$0xff]  ;;  %v60_v3 = vsel %vm47_vm0, %v43_v0, 0.0  ;;  %v40_v5 = vld [vmem:[%s828_s1 + $0x8] sm:$0xff]  ;;  %v63_v6 = vsel %vm47_vm0, %v44_v2, 0.0  ;;  %v41_v9 = vld [vmem:[%s828_s1 + $0x10] sm:$0xff]  ;;  %v66_v10 = vsel %vm47_vm0, %v45_v8, 0.0  ;;  %556 = vmatprep.mubr.msk.f32.mxu1 %vm593_vm3, %v591_v53  ;;  %545 = vmatprep.mubr.msk.f32.mxu0 %vm593_vm3, %v591_v53 }
   0x3   :  { %v48_v4 = vsel %vm47_vm0, %v39_v1, 0.0  ;;  %61 = vadd.xlane.f32.xlu1 %v60_v3  ;;  %v51_v7 = vsel %vm47_vm0, %v40_v5, 0.0  ;;  %v54_v11 = vsel %vm47_vm0, %v41_v9, 0.0  ;;  %v46_v12 = vld [vmem:[%s828_s1 + $0x38] sm:$0xff]  ;;  %v135_v16 = vld [vmem:[%s829_s0] sm:$0xff]  ;;  %v136_v17 = vld [vmem:[%s829_s0 + $0x8] sm:$0xff] }
   0x4   :  { %49 = vadd.xlane.f32.xlu0 %v48_v4  ;;  %v42_v13 = vld [vmem:[%s828_s1 + $0x18] sm:$0xff]  ;;  %v69_v14 = vsel %vm47_vm0, %v46_v12, 0.0  ;;  %v143_v18 = vld [vmem:[%s829_s0 + $0x40] sm:$0xff]  ;;  %v144_v19 = vld [vmem:[%s829_s0 + $0x48] sm:$0xff]  ;;  %v152_v20 = vsel %vm151_vm1, %v135_v16, 0.0  ;;  %v153_v21 = vsel %vm151_vm1, %v136_v17, 0.0 }
   0x5   :  { %v57_v15 = vsel %vm47_vm0, %v42_v13, 0.0  ;;  %v173_v22 = vsel %vm151_vm1, %v143_v18, 0.0  ;;  %v137_v23 = vld [vmem:[%s829_s0 + $0x10] sm:$0xff]  ;;  %v154_v25 = vadd.f32 %v153_v21, %v152_v20  ;;  %v174_v26 = vsel %vm151_vm1, %v144_v19, 0.0  ;;  %v138_v30 = vld [vmem:[%s829_s0 + $0x18] sm:$0xff]  ;;  %v139_v36 = vld [vmem:[%s829_s0 + $0x20] sm:$0xff] }
   0x6   :  { %v145_v24 = vld [vmem:[%s829_s0 + $0x50] sm:$0xff]  ;;  %v155_v27 = vsel %vm151_vm1, %v137_v23, 0.0  ;;  %v175_v28 = vadd.f32 %v174_v26, %v173_v22  ;;  %v146_v31 = vld [vmem:[%s829_s0 + $0x58] sm:$0xff]  ;;  %v157_v33 = vsel %vm151_vm1, %v138_v30, 0.0  ;;  %v147_v37 = vld [vmem:[%s829_s0 + $0x60] sm:$0xff]  ;;  %v159_v39 = vsel %vm151_vm1, %v139_v36, 0.0 }
   0x7   :  { %64 = vadd.xlane.f32.xlu1 %v63_v6  ;;  %v176_v29 = vsel %vm151_vm1, %v145_v24, 0.0  ;;  %v156_v32 = vadd.f32 %v155_v27, %v154_v25  ;;  %v178_v35 = vsel %vm151_vm1, %v146_v31, 0.0  ;;  %v180_v41 = vsel %vm151_vm1, %v147_v37, 0.0  ;;  %v140_v42 = vld [vmem:[%s829_s0 + $0x28] sm:$0xff]  ;;  %v141_v48 = vld [vmem:[%s829_s0 + $0x30] sm:$0xff]  ;;  %v142_v54 = vld [vmem:[%s829_s0 + $0x38] sm:$0xff] }
   0x8   :  { %52 = vadd.xlane.f32.xlu0 %v51_v7  ;;  %v177_v34 = vadd.f32 %v176_v29, %v175_v28  ;;  %v148_v43 = vld [vmem:[%s829_s0 + $0x68] sm:$0xff]  ;;  %v161_v45 = vsel %vm151_vm1, %v140_v42, 0.0  ;;  %v149_v49 = vld [vmem:[%s829_s0 + $0x70] sm:$0xff]  ;;  %v163_v51 = vsel %vm151_vm1, %v141_v48, 0.0  ;;  %v150_v55 = vld [vmem:[%s829_s0 + $0x78] sm:$0xff]  ;;  %v165_v58 = vsel %vm151_vm1, %v142_v54, 0.0 }
   0x9   :  { %v158_v38 = vadd.f32 %v157_v33, %v156_v32  ;;  %v182_v47 = vsel %vm151_vm1, %v148_v43, 0.0  ;;  %v184_v57 = vsel %vm151_vm1, %v149_v49, 0.0  ;;  %v186_v60 = vsel %vm151_vm1, %v150_v55, 0.0  ;;  %v199_v3 = vld [vmem:[%s830_s2] sm:$0xff]  ;;  %v200_v4 = vld [vmem:[%s830_s2 + $0x8] sm:$0xff]  ;;  %v201_v9 = vld [vmem:[%s830_s2 + $0x10] sm:$0xff] }
   0xa   :  { %v179_v40 = vadd.f32 %v178_v35, %v177_v34  ;;  %v592_v2 = vmov 0.0|0.0   ;;  %v203_v5 = vld [vmem:[%s831_s3] sm:$0xff]  ;;  %v566_v7 = vpack.c.bf16 %v200_v4, %v199_v3  ;;  %v204_v8 = vld [vmem:[%s831_s3 + $0x8] sm:$0xff]  ;;  %v205_v13 = vld [vmem:[%s831_s3 + $0x10] sm:$0xff]  ;;  %vm126_vm4 = vcmask 1041409  }
   0xb   :  { %67 = vadd.xlane.f32.xlu1 %v66_v10  ;;  %v160_v44 = vadd.f32 %v159_v39, %v158_v38  ;;  %565 = vmatprep.subr.bf16.mxu1 %v592_v2  ;;  %v202_v10 = vld [vmem:[%s830_s2 + $0x18] sm:$0xff]  ;;  %v560_v12 = vpack.c.bf16 %v204_v8, %v203_v5  ;;  %v80_v27 = vlaneseq  ;;  %vm91_vm5 = vcmask 130112   ;;  %v523_v4 = vld [vmem:[%s832_s4] ss:$0 sm:$0xff] }
   0xc   :  { %55 = vadd.xlane.f32.xlu0 %v54_v11  ;;  %v181_v46 = vadd.f32 %v180_v41, %v179_v40  ;;  %559 = vmatprep.subr.bf16.mxu0 %v592_v2  ;;  %v569_v16 = vpack.c.bf16 %v202_v10, %v201_v9  ;;  %vm98_vm6 = vcmask 195712   ;;  %vm105_vm7 = vcmask 261312  }
   0xd   :  { %v162_v50 = vadd.f32 %v161_v45, %v160_v44  ;;  %567 = vmatpush3.bf16.msra.mxu1 %v566_v7  ;;  %561 = vmatpush3.bf16.msra.mxu0 %v560_v12  ;;  %v81_v28 = vand.u32 127, %v80_v27  ;;  %v771_v33 = vshrl.u32 %v80_v27, 7  ;;  %v594_v27 = vmov -1.0  }
   0xe   :  { %v183_v52 = vadd.f32 %v182_v47, %v181_v46  ;;  %568 = vmatprep.subr.bf16.mxu1 %v592_v2  ;;  %562 = vmatprep.subr.bf16.mxu0 %v592_v2 }
   0xf   :  { %70 = vadd.xlane.f32.xlu1 %v69_v14  ;;  %v164_v56 = vadd.f32 %v163_v51, %v162_v50  ;;  %v206_v14 = vld [vmem:[%s831_s3 + $0x18] sm:$0xff]  ;;  %v86_v31 = vadd.s32 4294967288, %v81_v28  ;;  %v93_v32 = vadd.s32 4294967280, %v81_v28  ;;  %v100_v37 = vadd.s32 4294967272, %v81_v28 }
  0x10   :  { %58 = vadd.xlane.f32.xlu0 %v57_v15  ;;  %v185_v59 = vadd.f32 %v184_v57, %v183_v52  ;;  %v563_v18 = vpack.c.bf16 %v206_v14, %v205_v13  ;;  %v84_v39 = vsub.s32 %v81_v28, %v771_v33 }
  0x11   :  { %v166_v61 = vadd.f32 %v165_v58, %v164_v56  ;;  %570 = vmatpush3.bf16.msra.mxu1 %v569_v16  ;;  %v89_v36 = vsub.s32 %v86_v31, %v771_v33  ;;  %v96_v38 = vsub.s32 %v93_v32, %v771_v33  ;;  %v103_v44 = vsub.s32 %v100_v37, %v771_v33  ;;  %v38_v58 = vld [vmem:[#allocation2] sm:$0x3] }
  0x12   :  { %v187_v62 = vadd.f32 %v186_v60, %v185_v59  ;;  %564 = vmatpush3.bf16.msra.mxu0 %v563_v18 }
  0x13   :  { %v167_v63 = vrot.slane %v166_v61, 4 }
  0x14   :  { %v188_v0 = vrot.slane %v187_v62, 4 }
  0x15   :  { %v168_v1 = vadd.f32 %v167_v63, %v166_v61 }
  0x16   :  { %v189_v6 = vadd.f32 %v188_v0, %v187_v62 }
  0x17   :  { %v169_v11 = vrot.slane %v168_v1, 2 }
  0x18   :  { %v190_v15 = vrot.slane %v189_v6, 2 }
  0x19   :  { %v170_v17 = vadd.f32 %v169_v11, %v168_v1 }
  0x1a   :  { %v191_v19 = vadd.f32 %v190_v15, %v189_v6 }
  0x1b   :  { %v171_v20 = vrot.slane %v170_v17, 1 }
  0x1c   :  { %v192_v21 = vrot.slane %v191_v19, 1 }
  0x1d   :  { %v172_v22 = vadd.f32 %v171_v20, %v170_v17 }
  0x1e   :  { %v193_v23 = vadd.f32 %v192_v21, %v191_v19 }
  0x1f   :  { %v195_v24 = vmul.f32 0.015625, %v172_v22 }
  0x20   :  { %v196_v25 = vmul.f32 0.015625, %v193_v23 }
  0x22   :  { %v282_v26 = vsel %vm126_vm4, %v196_v25, %v195_v24 }
  0x23   :  { %557 = vmatmul.mubr.msk.f32.vlgmr.msra.gmra.mrb[0].mxu1 %vm151_vm1, %v282_v26 }
  0x90   :  { %v62_v29 = vpop.xlane.xlu1 %61 }
  0x91   :  { %v50_v30 = vpop.xlane.xlu0 %49  ;;  %v110_v47 = vrot.slane %v62_v29, %v84_v39 }
  0x92   :  { %v85_v48 = vrot.slane %v50_v30, %v84_v39 }
  0x94   :  { %v65_v34 = vpop.xlane.xlu1 %64 }
  0x95   :  { %v53_v35 = vpop.xlane.xlu0 %52  ;;  %v114_v42 = vrot.slane %v65_v34, %v89_v36 }
  0x96   :  { %v90_v43 = vrot.slane %v53_v35, %v89_v36 }
  0x97   :  { %v115_v51 = vsel %vm91_vm5, %v114_v42, %v110_v47  ;;  %v427_v47 = vld [vmem:[%s833_s7 + $0x38] sm:$0xff] }
  0x98   :  { %v68_v40 = vpop.xlane.xlu1 %67  ;;  %v92_v52 = vsel %vm91_vm5, %v90_v43, %v85_v48  ;;  %v420_v43 = vld [vmem:[%s833_s7] sm:$0xff] }
  0x99   :  { %v56_v41 = vpop.xlane.xlu0 %55  ;;  %v119_v45 = vrot.slane %v68_v40, %v96_v38  ;;  %v421_v40 = vld [vmem:[%s833_s7 + $0x8] sm:$0xff] }
  0x9a   :  { %v97_v46 = vrot.slane %v56_v41, %v96_v38  ;;  %v423_v41 = vld [vmem:[%s833_s7 + $0x18] sm:$0xff] }
  0x9b   :  { %v120_v56 = vsel %vm98_vm6, %v119_v45, %v115_v51  ;;  %v571_v42 = vpack.c.bf16 %v423_v41, %v421_v40 }
  0x9c   :  { %v71_v49 = vpop.xlane.xlu1 %70  ;;  %v99_v57 = vsel %vm98_vm6, %v97_v46, %v92_v52  ;;  %v425_v46 = vld [vmem:[%s833_s7 + $0x28] sm:$0xff] }
  0x9d   :  { %v59_v50 = vpop.xlane.xlu0 %58  ;;  %v124_v54 = vrot.slane %v71_v49, %v103_v44  ;;  %572 = vmatprep.subr.bf16.mxu0 %v571_v42  ;;  %v575_v48 = vpack.c.bf16 %v427_v47, %v425_v46  ;;  %v424_v49 = vld [vmem:[%s833_s7 + $0x20] sm:$0xff] }
  0x9e   :  { %v104_v55 = vrot.slane %v59_v50, %v103_v44  ;;  %v422_v44 = vld [vmem:[%s833_s7 + $0x10] sm:$0xff] }
  0x9f   :  { %v125_v59 = vsel %vm105_vm7, %v124_v54, %v120_v56  ;;  %v573_v45 = vpack.c.bf16 %v422_v44, %v420_v43  ;;  %v426_v50 = vld [vmem:[%s833_s7 + $0x30] sm:$0xff] }
  0xa0   :  { %v106_v60 = vsel %vm105_vm7, %v104_v55, %v99_v57  ;;  %v577_v51 = vpack.c.bf16 %v426_v50, %v424_v49  ;;  %v524_v57 = vld [vmem:[%s834_s5] ss:$0 sm:$0xff] }
  0xa1   :  { %v127_v61 = vsel %vm126_vm4, %v125_v59, %v106_v60  ;;  %v525_v59 = vld [vmem:[%s835_s6] ss:$0 sm:$0xff] }
  0xa2   :  { %v129_v62 = vadd.f32 %v127_v61, %v38_v58 }
  0xa4   :  { %131 = vst.msk [vmem:[#allocation2] sm:$0x3] %vm36_vm2, %v129_v62  ;;  %v432_v62 = vsub.s32 0, %v771_v33 }
  0xab   :  { %v197_v63 = vld [vmem:[#allocation2] sm:$0x3] }
  0xac   :  { %v198_v0 = vmul.f32 0.015625, %v197_v63  ;;  %v428_v63 = vld [vmem:[%s836_s8] sm:$0x3] }
  0xae   :  { %546 = vmatmul.mubr.msk.f32.vlgmr.msra.gmra.mrb[0].mxu0 %vm151_vm1, %v198_v0  ;;  %v436_v0 = vsub.s32 1, %v771_v33 }
  0xaf   :  { %507 = vmatprep.mubr.f32.mxu0 %v591_v53  ;;  %574 = vmatpush1.bf16.msra.mxu0 %v573_v45 }
  0xb0   :  { %576 = vmatprep.subr.bf16.mxu0 %v575_v48 }
  0xb3   :  { %578 = vmatpush1.bf16.msra.mxu0 %v577_v51 }
  0xf6   :  { %v351_v1 = vpop.f32.mrb[0].mxu1 }
  0xf7   :  { %v558_v2 = vpop.f32.mrb[1].mxu1 }
  0xf8   :  { %v437_v2 = vrot.slane %v428_v63, %v436_v0 }
 0x181   :  { %v276_v3 = vpop.f32.mrb[0].mxu0 }
 0x182   :  { %v352_v5 = vadd.f32 %v351_v1, %v276_v3  ;;  %v547_v6 = vpop.f32.mrb[1].mxu0  ;;  %v433_v1 = vrot.slane %v428_v63, %v432_v62 }
 0x184   :  { %v362_v7 = vadd.f32 %v523_v4, %v352_v5 }
 0x186   :  { %v364_v8 = vmul.f32 0.70710677, %v362_v7  ;;  %v363_v30 = vmul.f32 0.5, %v362_v7 }
 0x188   :  { %v367_v9 = vand.u32 2147483647, %v364_v8  ;;  %vm365_vm8 = vcmp.ge.f32.partialorder %v364_v8, 0.0 }
 0x189   :  { %v366_v28 = vsel %vm365_vm8, 1.0, %v594_v27 }
 0x18a   :  { %v368_v10 = vmul.f32 0.3275911, %v367_v9  ;;  %v381_v12 = vsub.f32 0.0, %v367_v9 }
 0x18c   :  { %v369_v11 = vadd.f32 1.0, %v368_v10  ;;  %v382_v14 = vmul.f32 %v381_v12, %v367_v9 }
 0x18e   :  { %583 = vrcp.f32 %v369_v11  ;;  %v383_v16 = vmul.f32 1.442695, %v382_v14 }
 0x190   :  { %585 = vpow2.f32 %v383_v16 }
 0x198   :  { %v584_v13 = vpop.eup %583 }
 0x199   :  { %v372_v15 = vmul.f32 1.0614054, %v584_v13 }
 0x19a   :  { %v586_v24 = vpop.eup %585 }
 0x19b   :  { %v373_v53 = vadd.f32 -1.4531521, %v372_v15 }
 0x19d   :  { %v374_v17 = vmul.f32 %v584_v13, %v373_v53 }
 0x19f   :  { %v375_v18 = vadd.f32 1.4214138, %v374_v17 }
 0x1a1   :  { %v376_v19 = vmul.f32 %v584_v13, %v375_v18 }
 0x1a3   :  { %v377_v20 = vadd.f32 -0.28449672, %v376_v19 }
 0x1a5   :  { %v378_v21 = vmul.f32 %v584_v13, %v377_v20 }
 0x1a7   :  { %v379_v22 = vadd.f32 0.2548296, %v378_v21 }
 0x1a9   :  { %v380_v23 = vmul.f32 %v584_v13, %v379_v22 }
 0x1ab   :  { %v385_v25 = vmul.f32 %v586_v24, %v380_v23 }
 0x1ad   :  { %v386_v26 = vsub.f32 1.0, %v385_v25 }
 0x1af   :  { %v387_v29 = vmul.f32 %v386_v26, %v366_v28 }
 0x1b1   :  { %v388_v31 = vadd.f32 1.0, %v387_v29 }
 0x1b3   :  { %v389_v32 = vmul.f32 %v388_v31, %v363_v30 }
 0x1b5   :  { %v390_v34 = vsel %vm36_vm2, %v389_v32, 0.0 }
 0x1b6   :  { %391 = vadd.xlane.f32.xlu0 %v390_v34 }
 0x243   :  { %v392_v35 = vpop.xlane.xlu0 %391 }
 0x244   :  { %v394_v36 = vmul.f32 0.03125, %v392_v35 }
 0x246   :  { %v395_v37 = vsub.f32 %v389_v32, %v394_v36 }
 0x248   :  { %v396_v38 = vmul.f32 %v395_v37, %v395_v37 }
 0x24a   :  { %v397_v39 = vsel %vm36_vm2, %v396_v38, 0.0 }
 0x24b   :  { %398 = vadd.xlane.f32.xlu1 %v397_v39 }
 0x2d8   :  { %v399_v52 = vpop.xlane.xlu1 %398 }
 0x2d9   :  { %v400_v54 = vmul.f32 0.03125, %v399_v52 }
 0x2db   :  { %v401_v55 = vadd.f32 1e-05, %v400_v54 }
 0x2dd   :  { %587 = vrsqrt.f32 %v401_v55 }
 0x2e7   :  { %v588_v56 = vpop.eup %587 }
 0x2e8   :  { %v403_v58 = vmul.f32 %v588_v56, %v395_v37 }
 0x2ea   :  { %v411_v60 = vmul.f32 %v524_v57, %v403_v58 }
 0x2ec   :  { %v419_v61 = vadd.f32 %v525_v59, %v411_v60 }
 0x2ee   :  { %526 = vmatmul.mubr.msk.f32.vlgmr.msra.gmra.mrb[2].mxu0 %vm151_vm1, %v419_v61 }
 0x3c1   :  { %v509_v3 = vpop.f32.mrb[2].mxu0 }
 0x3c2   :  { %v510_v4 = vadd.f32 %v509_v3, %v433_v1  ;;  %v511_v5 = vpop.f32.mrb[3].mxu0 }
 0x3c3   :  { %v512_v6 = vadd.f32 %v511_v5, %v437_v2 }
 0x3c4   :  { %514 = vst [vmem:[%s837_s9] sm:$0x3] %v510_v4 }
 0x3c5   :  { %589 = vtanh.f32 %v512_v6 }
 0x3cf   :  { %v590_v7 = vpop.eup %589 }
 0x3d0   :  { %516 = vst [vmem:[%s837_s9 + $0x2] sm:$0x3] %v590_v7 }

</bundles_post_ra>
